<compile_context>
chip_gen: v7x
topology: tpu7x:2x2x1
jax: 0.10.0
libtpu: 0.0.40
codegen_flags: <defaults>
</compile_context>

<pallas_src>
import jax
import jax.numpy as jnp
from jax.experimental import pallas as pl
from jax.experimental.pallas import tpu as pltpu

# Hyperparameters (the PyTorch file leaves d_model / n_heads / d_head as
# placeholders; pick small, self-consistent values: d_model = n_heads*d_head).
D_MODEL = 32
N_HEADS = 4
D_HEAD = D_MODEL // N_HEADS


def mha_kernel(q_ref, k_ref, v_ref, mask_ref, wqkv_ref, wo_ref, out_ref):
    B, S, D = q_ref.shape
    H, Dh = N_HEADS, D_HEAD

    # ---- fused Q/K/V projection: one (B*S, 3D) @ (3D, 3D) MXU matmul ----
    xq = q_ref[...].reshape(B * S, D)
    xk = k_ref[...].reshape(B * S, D)
    xv = v_ref[...].reshape(B * S, D)
    xcat = jnp.concatenate([xq, xk, xv], axis=-1)                    # (B*S, 3D)
    qkv = jnp.dot(xcat, wqkv_ref[...],
                  preferred_element_type=jnp.float32)                # (B*S, 3D)

    # ---- gather into head/batch-stacked (H*B, S, Dh), index n = h*B + b ----
    def split_heads(col0):
        return jnp.stack(
            [qkv[b * S:(b + 1) * S, col0 + h * Dh: col0 + (h + 1) * Dh]
             for h in range(H) for b in range(B)], axis=0)

    q3 = split_heads(0)        # already scaled by 1/sqrt(Dh) via the weight
    k3 = split_heads(D)
    v3 = split_heads(2 * D)

    # additive mask broadcast over heads: element n uses mask[n % B] = mask[b]
    mask_big = jnp.concatenate([mask_ref[...]] * H, axis=0)          # (H*B, S, S)

    # ---- attention: one batched contraction + one softmax for all heads ----
    scores = jnp.einsum('nqd,nkd->nqk', q3, k3,
                        preferred_element_type=jnp.float32) + mask_big
    scores = scores - jnp.max(scores, axis=-1, keepdims=True)
    e = jnp.exp(scores)
    attn = e * pl.reciprocal(jnp.sum(e, axis=-1, keepdims=True), approx=True)
    ctx3 = jnp.einsum('nqk,nkd->nqd', attn, v3,
                      preferred_element_type=jnp.float32)            # (H*B, S, Dh)

    # ---- merge heads back to (B*S, D) and apply the output projection ----
    ctx2d = jnp.concatenate(
        [jnp.concatenate([ctx3[h * B + b] for h in range(H)], axis=-1)
         for b in range(B)], axis=0)                                 # (B*S, D)
    out = jnp.dot(ctx2d, wo_ref[...], preferred_element_type=jnp.float32)
    out_ref[...] = out.reshape(B, S, D).astype(out_ref.dtype)


@jax.jit
def multi_head_attention_pallas(input_q, input_k, input_v, mask, wq, wk, wv, wo):
    B, S, D = input_q.shape
    # Fold the 1/sqrt(d_head) scale into W_Q and fuse the three projection
    # weights into one block-diagonal (3D, 3D) matrix (host/XLA side, free).
    scale = 1.0 / jnp.sqrt(jnp.float32(D_HEAD))
    wqkv = jnp.zeros((3 * D, 3 * D), jnp.float32)
    wqkv = wqkv.at[:D, :D].set(wq * scale)
    wqkv = wqkv.at[D:2 * D, D:2 * D].set(wk)
    wqkv = wqkv.at[2 * D:, 2 * D:].set(wv)

    return pl.pallas_call(
        mha_kernel,
        out_shape=jax.ShapeDtypeStruct((B, S, D), input_q.dtype),
        grid=(1,),
        in_specs=[
            pl.BlockSpec((B, S, D), lambda i: (0, 0, 0)),        # input_Q
            pl.BlockSpec((B, S, D), lambda i: (0, 0, 0)),        # input_K
            pl.BlockSpec((B, S, D), lambda i: (0, 0, 0)),        # input_V
            pl.BlockSpec((B, S, S), lambda i: (0, 0, 0)),        # additive mask
            pl.BlockSpec((3 * D, 3 * D), lambda i: (0, 0)),      # fused W_QKV
            pl.BlockSpec((D, D), lambda i: (0, 0)),              # W_O (fc)
        ],
        out_specs=pl.BlockSpec((B, S, D), lambda i: (0, 0, 0)),
        compiler_params=pltpu.CompilerParams(
            dimension_semantics=("arbitrary",)),
    )(input_q, input_k, input_v, mask, wqkv, wo)


# --- pure-JAX reference mirroring the PyTorch forward ---
def mha_ref(input_q, input_k, input_v, mask, wq, wk, wv, wo):
    B, S, D = input_q.shape

    def heads(x, w):
        return (x @ w).reshape(B, S, N_HEADS, D_HEAD).transpose(0, 2, 1, 3)

    q, k, v = heads(input_q, wq), heads(input_k, wk), heads(input_v, wv)
    scores = jnp.einsum('bhqd,bhkd->bhqk', q, k) / jnp.sqrt(jnp.float32(D_HEAD))
    scores = scores + mask[:, None, :, :]
    attn = jax.nn.softmax(scores, axis=-1)
    ctx = jnp.einsum('bhqk,bhkd->bhqd', attn, v)
    ctx = ctx.transpose(0, 2, 1, 3).reshape(B, S, D)
    return ctx @ wo


if __name__ == "__main__":
    key = jax.random.PRNGKey(0)
    kq, kk, kv, kw = jax.random.split(key, 4)

    B, S = 2, 8
    input_q = jax.random.normal(kq, (B, S, D_MODEL), jnp.float32)
    input_k = jax.random.normal(kk, (B, S, D_MODEL), jnp.float32)
    input_v = jax.random.normal(kv, (B, S, D_MODEL), jnp.float32)

    # Additive causal mask (0 = keep, -1e9 = masked), shape [B, S, S],
    # broadcast over heads exactly like the PyTorch `scores += mask`.
    causal = jnp.where(jnp.tril(jnp.ones((S, S), dtype=bool)), 0.0, -1e9)
    mask = jnp.broadcast_to(causal.astype(jnp.float32), (B, S, S))

    ws = jax.random.split(kw, 4)
    wq = 0.05 * jax.random.normal(ws[0], (D_MODEL, D_MODEL), jnp.float32)
    wk = 0.05 * jax.random.normal(ws[1], (D_MODEL, D_MODEL), jnp.float32)
    wv = 0.05 * jax.random.normal(ws[2], (D_MODEL, D_MODEL), jnp.float32)
    wo = 0.05 * jax.random.normal(ws[3], (D_MODEL, D_MODEL), jnp.float32)

    out = multi_head_attention_pallas(input_q, input_k, input_v, mask,
                                      wq, wk, wv, wo)
    out = jax.block_until_ready(out)

    ref = mha_ref(input_q, input_k, input_v, mask, wq, wk, wv, wo)
    assert out.shape == (B, S, D_MODEL)
    err = float(jnp.max(jnp.abs(out - ref)))
    assert jnp.allclose(out, ref, atol=2e-3, rtol=2e-3), err
    print("KERNEL_OK")
</pallas_src>

<mosaic_0001>
module attributes {stable_mosaic.version = 11 : i64} {
  func.func @mha_kernel(%arg0: i32, %arg1: memref<2x8x32xf32, #tpu.memory_space<vmem>>, %arg2: memref<2x8x32xf32, #tpu.memory_space<vmem>>, %arg3: memref<2x8x32xf32, #tpu.memory_space<vmem>>, %arg4: memref<2x8x8xf32, #tpu.memory_space<vmem>>, %arg5: memref<96x96xf32, #tpu.memory_space<vmem>>, %arg6: memref<32x32xf32, #tpu.memory_space<vmem>>, %arg7: memref<2x8x32xf32, #tpu.memory_space<vmem>>) attributes {dimension_semantics = [#tpu.dimension_semantics<arbitrary>], iteration_bounds = array<i64: 1>, scalar_prefetch = 0 : i64, scratch_operands = 0 : i64, tpu.core_type = #tpu.core_type<tc>, window_params = [{pipeline_mode = #tpu.pipeline_mode<synchronous>, transform_indices = @transform_0, window_bounds = array<i64: 2, 8, 32>}, {pipeline_mode = #tpu.pipeline_mode<synchronous>, transform_indices = @transform_1, window_bounds = array<i64: 2, 8, 32>}, {pipeline_mode = #tpu.pipeline_mode<synchronous>, transform_indices = @transform_2, window_bounds = array<i64: 2, 8, 32>}, {pipeline_mode = #tpu.pipeline_mode<synchronous>, transform_indices = @transform_3, window_bounds = array<i64: 2, 8, 8>}, {pipeline_mode = #tpu.pipeline_mode<synchronous>, transform_indices = @transform_4, window_bounds = array<i64: 96, 96>}, {pipeline_mode = #tpu.pipeline_mode<synchronous>, transform_indices = @transform_5, window_bounds = array<i64: 32, 32>}, {pipeline_mode = #tpu.pipeline_mode<synchronous>, transform_indices = @transform_6, window_bounds = array<i64: 2, 8, 32>}]} {
    %c0 = arith.constant 0 : index
    %c0_0 = arith.constant 0 : index
    %c0_1 = arith.constant 0 : index
    %0 = vector.load %arg1[%c0, %c0_0, %c0_1] : memref<2x8x32xf32, #tpu.memory_space<vmem>>, vector<2x8x32xf32>
    %1 = vector.shape_cast %0 : vector<2x8x32xf32> to vector<16x32xf32>
    %c0_2 = arith.constant 0 : index
    %c0_3 = arith.constant 0 : index
    %c0_4 = arith.constant 0 : index
    %2 = vector.load %arg2[%c0_2, %c0_3, %c0_4] : memref<2x8x32xf32, #tpu.memory_space<vmem>>, vector<2x8x32xf32>
    %3 = vector.shape_cast %2 : vector<2x8x32xf32> to vector<16x32xf32>
    %c0_5 = arith.constant 0 : index
    %c0_6 = arith.constant 0 : index
    %c0_7 = arith.constant 0 : index
    %4 = vector.load %arg3[%c0_5, %c0_6, %c0_7] : memref<2x8x32xf32, #tpu.memory_space<vmem>>, vector<2x8x32xf32>
    %5 = vector.shape_cast %4 : vector<2x8x32xf32> to vector<16x32xf32>
    %6 = tpu.concatenate %1, %3, %5 in 1 : vector<16x32xf32>, vector<16x32xf32>, vector<16x32xf32> -> vector<16x96xf32>
    %c0_8 = arith.constant 0 : index
    %c0_9 = arith.constant 0 : index
    %7 = vector.load %arg5[%c0_8, %c0_9] : memref<96x96xf32, #tpu.memory_space<vmem>>, vector<96x96xf32>
    %cst = arith.constant dense<0.000000e+00> : vector<16x96xf32>
    %8 = tpu.matmul %6, %7, %cst {dimension_numbers = #tpu.dot_dimension_numbers<[1], [0], [0], [1], [0, 0, 1, 1], [], []>} : vector<16x96xf32>, vector<96x96xf32>, vector<16x96xf32> -> vector<16x96xf32>
    %9 = vector.extract_strided_slice %8 {offsets = [0, 0], sizes = [8, 8], strides = [1, 1]} : vector<16x96xf32> to vector<8x8xf32>
    %10 = vector.extract_strided_slice %8 {offsets = [8, 0], sizes = [8, 8], strides = [1, 1]} : vector<16x96xf32> to vector<8x8xf32>
    %11 = vector.extract_strided_slice %8 {offsets = [0, 8], sizes = [8, 8], strides = [1, 1]} : vector<16x96xf32> to vector<8x8xf32>
    %12 = vector.extract_strided_slice %8 {offsets = [8, 8], sizes = [8, 8], strides = [1, 1]} : vector<16x96xf32> to vector<8x8xf32>
    %13 = vector.extract_strided_slice %8 {offsets = [0, 16], sizes = [8, 8], strides = [1, 1]} : vector<16x96xf32> to vector<8x8xf32>
    %14 = vector.extract_strided_slice %8 {offsets = [8, 16], sizes = [8, 8], strides = [1, 1]} : vector<16x96xf32> to vector<8x8xf32>
    %15 = vector.extract_strided_slice %8 {offsets = [0, 24], sizes = [8, 8], strides = [1, 1]} : vector<16x96xf32> to vector<8x8xf32>
    %16 = vector.extract_strided_slice %8 {offsets = [8, 24], sizes = [8, 8], strides = [1, 1]} : vector<16x96xf32> to vector<8x8xf32>
    %17 = vector.shape_cast %9 : vector<8x8xf32> to vector<1x8x8xf32>
    %18 = vector.shape_cast %10 : vector<8x8xf32> to vector<1x8x8xf32>
    %19 = vector.shape_cast %11 : vector<8x8xf32> to vector<1x8x8xf32>
    %20 = vector.shape_cast %12 : vector<8x8xf32> to vector<1x8x8xf32>
    %21 = vector.shape_cast %13 : vector<8x8xf32> to vector<1x8x8xf32>
    %22 = vector.shape_cast %14 : vector<8x8xf32> to vector<1x8x8xf32>
    %23 = vector.shape_cast %15 : vector<8x8xf32> to vector<1x8x8xf32>
    %24 = vector.shape_cast %16 : vector<8x8xf32> to vector<1x8x8xf32>
    %25 = tpu.concatenate %17, %18, %19, %20, %21, %22, %23, %24 in 0 : vector<1x8x8xf32>, vector<1x8x8xf32>, vector<1x8x8xf32>, vector<1x8x8xf32>, vector<1x8x8xf32>, vector<1x8x8xf32>, vector<1x8x8xf32>, vector<1x8x8xf32> -> vector<8x8x8xf32>
    %26 = vector.extract_strided_slice %8 {offsets = [0, 32], sizes = [8, 8], strides = [1, 1]} : vector<16x96xf32> to vector<8x8xf32>
    %27 = vector.extract_strided_slice %8 {offsets = [8, 32], sizes = [8, 8], strides = [1, 1]} : vector<16x96xf32> to vector<8x8xf32>
    %28 = vector.extract_strided_slice %8 {offsets = [0, 40], sizes = [8, 8], strides = [1, 1]} : vector<16x96xf32> to vector<8x8xf32>
    %29 = vector.extract_strided_slice %8 {offsets = [8, 40], sizes = [8, 8], strides = [1, 1]} : vector<16x96xf32> to vector<8x8xf32>
    %30 = vector.extract_strided_slice %8 {offsets = [0, 48], sizes = [8, 8], strides = [1, 1]} : vector<16x96xf32> to vector<8x8xf32>
    %31 = vector.extract_strided_slice %8 {offsets = [8, 48], sizes = [8, 8], strides = [1, 1]} : vector<16x96xf32> to vector<8x8xf32>
    %32 = vector.extract_strided_slice %8 {offsets = [0, 56], sizes = [8, 8], strides = [1, 1]} : vector<16x96xf32> to vector<8x8xf32>
    %33 = vector.extract_strided_slice %8 {offsets = [8, 56], sizes = [8, 8], strides = [1, 1]} : vector<16x96xf32> to vector<8x8xf32>
    %34 = vector.shape_cast %26 : vector<8x8xf32> to vector<1x8x8xf32>
    %35 = vector.shape_cast %27 : vector<8x8xf32> to vector<1x8x8xf32>
    %36 = vector.shape_cast %28 : vector<8x8xf32> to vector<1x8x8xf32>
    %37 = vector.shape_cast %29 : vector<8x8xf32> to vector<1x8x8xf32>
    %38 = vector.shape_cast %30 : vector<8x8xf32> to vector<1x8x8xf32>
    %39 = vector.shape_cast %31 : vector<8x8xf32> to vector<1x8x8xf32>
    %40 = vector.shape_cast %32 : vector<8x8xf32> to vector<1x8x8xf32>
    %41 = vector.shape_cast %33 : vector<8x8xf32> to vector<1x8x8xf32>
    %42 = tpu.concatenate %34, %35, %36, %37, %38, %39, %40, %41 in 0 : vector<1x8x8xf32>, vector<1x8x8xf32>, vector<1x8x8xf32>, vector<1x8x8xf32>, vector<1x8x8xf32>, vector<1x8x8xf32>, vector<1x8x8xf32>, vector<1x8x8xf32> -> vector<8x8x8xf32>
    %43 = vector.extract_strided_slice %8 {offsets = [0, 64], sizes = [8, 8], strides = [1, 1]} : vector<16x96xf32> to vector<8x8xf32>
    %44 = vector.extract_strided_slice %8 {offsets = [8, 64], sizes = [8, 8], strides = [1, 1]} : vector<16x96xf32> to vector<8x8xf32>
    %45 = vector.extract_strided_slice %8 {offsets = [0, 72], sizes = [8, 8], strides = [1, 1]} : vector<16x96xf32> to vector<8x8xf32>
    %46 = vector.extract_strided_slice %8 {offsets = [8, 72], sizes = [8, 8], strides = [1, 1]} : vector<16x96xf32> to vector<8x8xf32>
    %47 = vector.extract_strided_slice %8 {offsets = [0, 80], sizes = [8, 8], strides = [1, 1]} : vector<16x96xf32> to vector<8x8xf32>
    %48 = vector.extract_strided_slice %8 {offsets = [8, 80], sizes = [8, 8], strides = [1, 1]} : vector<16x96xf32> to vector<8x8xf32>
    %49 = vector.extract_strided_slice %8 {offsets = [0, 88], sizes = [8, 8], strides = [1, 1]} : vector<16x96xf32> to vector<8x8xf32>
    %50 = vector.extract_strided_slice %8 {offsets = [8, 88], sizes = [8, 8], strides = [1, 1]} : vector<16x96xf32> to vector<8x8xf32>
    %51 = vector.shape_cast %43 : vector<8x8xf32> to vector<1x8x8xf32>
    %52 = vector.shape_cast %44 : vector<8x8xf32> to vector<1x8x8xf32>
    %53 = vector.shape_cast %45 : vector<8x8xf32> to vector<1x8x8xf32>
    %54 = vector.shape_cast %46 : vector<8x8xf32> to vector<1x8x8xf32>
    %55 = vector.shape_cast %47 : vector<8x8xf32> to vector<1x8x8xf32>
    %56 = vector.shape_cast %48 : vector<8x8xf32> to vector<1x8x8xf32>
    %57 = vector.shape_cast %49 : vector<8x8xf32> to vector<1x8x8xf32>
    %58 = vector.shape_cast %50 : vector<8x8xf32> to vector<1x8x8xf32>
    %59 = tpu.concatenate %51, %52, %53, %54, %55, %56, %57, %58 in 0 : vector<1x8x8xf32>, vector<1x8x8xf32>, vector<1x8x8xf32>, vector<1x8x8xf32>, vector<1x8x8xf32>, vector<1x8x8xf32>, vector<1x8x8xf32>, vector<1x8x8xf32> -> vector<8x8x8xf32>
    %c0_10 = arith.constant 0 : index
    %c0_11 = arith.constant 0 : index
    %c0_12 = arith.constant 0 : index
    %60 = vector.load %arg4[%c0_10, %c0_11, %c0_12] : memref<2x8x8xf32, #tpu.memory_space<vmem>>, vector<2x8x8xf32>
    %61 = tpu.concatenate %60, %60, %60, %60 in 0 : vector<2x8x8xf32>, vector<2x8x8xf32>, vector<2x8x8xf32>, vector<2x8x8xf32> -> vector<8x8x8xf32>
    "tpu.trace_start"() <{level = 10 : i32, message = "nqd,nkd->nqk"}> : () -> ()
    %cst_13 = arith.constant dense<0.000000e+00> : vector<8x8x8xf32>
    %62 = tpu.matmul %25, %42, %cst_13 {dimension_numbers = #tpu.dot_dimension_numbers<[2], [2], [1], [1], [0, 0, 0, 1, 1, 1], [0], [0]>} : vector<8x8x8xf32>, vector<8x8x8xf32>, vector<8x8x8xf32> -> vector<8x8x8xf32>
    "tpu.trace_stop"() : () -> ()
    %63 = arith.addf %62, %61 : vector<8x8x8xf32>
    %cst_14 = arith.constant dense<0xFF800000> : vector<8x8xf32>
    %64 = vector.multi_reduction <maximumf>, %63, %cst_14 [2] : vector<8x8x8xf32> to vector<8x8xf32>
    %65 = vector.shape_cast %64 : vector<8x8xf32> to vector<8x8x1xf32>
    %66 = vector.broadcast %65 : vector<8x8x1xf32> to vector<8x8x8xf32>
    %67 = arith.subf %63, %66 : vector<8x8x8xf32>
    %68 = math.exp %67 : vector<8x8x8xf32>
    %cst_15 = arith.constant dense<0.000000e+00> : vector<8x8xf32>
    %69 = vector.multi_reduction <add>, %68, %cst_15 [2] : vector<8x8x8xf32> to vector<8x8xf32>
    %70 = vector.shape_cast %69 : vector<8x8xf32> to vector<8x8x1xf32>
    %71 = tpu.reciprocal %70 {approx = true} : vector<8x8x1xf32> -> vector<8x8x1xf32>
    %72 = vector.broadcast %71 : vector<8x8x1xf32> to vector<8x8x8xf32>
    %73 = arith.mulf %68, %72 : vector<8x8x8xf32>
    "tpu.trace_start"() <{level = 10 : i32, message = "nqk,nkd->nqd"}> : () -> ()
    %cst_16 = arith.constant dense<0.000000e+00> : vector<8x8x8xf32>
    %74 = tpu.matmul %73, %59, %cst_16 {dimension_numbers = #tpu.dot_dimension_numbers<[2], [1], [1], [2], [0, 0, 0, 1, 1, 2], [0], [0]>} : vector<8x8x8xf32>, vector<8x8x8xf32>, vector<8x8x8xf32> -> vector<8x8x8xf32>
    "tpu.trace_stop"() : () -> ()
    %75 = vector.extract_strided_slice %74 {offsets = [0, 0, 0], sizes = [1, 8, 8], strides = [1, 1, 1]} : vector<8x8x8xf32> to vector<1x8x8xf32>
    %76 = vector.shape_cast %75 : vector<1x8x8xf32> to vector<8x8xf32>
    %77 = vector.extract_strided_slice %74 {offsets = [2, 0, 0], sizes = [1, 8, 8], strides = [1, 1, 1]} : vector<8x8x8xf32> to vector<1x8x8xf32>
    %78 = vector.shape_cast %77 : vector<1x8x8xf32> to vector<8x8xf32>
    %79 = vector.extract_strided_slice %74 {offsets = [4, 0, 0], sizes = [1, 8, 8], strides = [1, 1, 1]} : vector<8x8x8xf32> to vector<1x8x8xf32>
    %80 = vector.shape_cast %79 : vector<1x8x8xf32> to vector<8x8xf32>
    %81 = vector.extract_strided_slice %74 {offsets = [6, 0, 0], sizes = [1, 8, 8], strides = [1, 1, 1]} : vector<8x8x8xf32> to vector<1x8x8xf32>
    %82 = vector.shape_cast %81 : vector<1x8x8xf32> to vector<8x8xf32>
    %83 = tpu.concatenate %76, %78, %80, %82 in 1 : vector<8x8xf32>, vector<8x8xf32>, vector<8x8xf32>, vector<8x8xf32> -> vector<8x32xf32>
    %84 = vector.extract_strided_slice %74 {offsets = [1, 0, 0], sizes = [1, 8, 8], strides = [1, 1, 1]} : vector<8x8x8xf32> to vector<1x8x8xf32>
    %85 = vector.shape_cast %84 : vector<1x8x8xf32> to vector<8x8xf32>
    %86 = vector.extract_strided_slice %74 {offsets = [3, 0, 0], sizes = [1, 8, 8], strides = [1, 1, 1]} : vector<8x8x8xf32> to vector<1x8x8xf32>
    %87 = vector.shape_cast %86 : vector<1x8x8xf32> to vector<8x8xf32>
    %88 = vector.extract_strided_slice %74 {offsets = [5, 0, 0], sizes = [1, 8, 8], strides = [1, 1, 1]} : vector<8x8x8xf32> to vector<1x8x8xf32>
    %89 = vector.shape_cast %88 : vector<1x8x8xf32> to vector<8x8xf32>
    %90 = vector.extract_strided_slice %74 {offsets = [7, 0, 0], sizes = [1, 8, 8], strides = [1, 1, 1]} : vector<8x8x8xf32> to vector<1x8x8xf32>
    %91 = vector.shape_cast %90 : vector<1x8x8xf32> to vector<8x8xf32>
    %92 = tpu.concatenate %85, %87, %89, %91 in 1 : vector<8x8xf32>, vector<8x8xf32>, vector<8x8xf32>, vector<8x8xf32> -> vector<8x32xf32>
    %93 = tpu.concatenate %83, %92 in 0 : vector<8x32xf32>, vector<8x32xf32> -> vector<16x32xf32>
    %c0_17 = arith.constant 0 : index
    %c0_18 = arith.constant 0 : index
    %94 = vector.load %arg6[%c0_17, %c0_18] : memref<32x32xf32, #tpu.memory_space<vmem>>, vector<32x32xf32>
    %cst_19 = arith.constant dense<0.000000e+00> : vector<16x32xf32>
    %95 = tpu.matmul %93, %94, %cst_19 {dimension_numbers = #tpu.dot_dimension_numbers<[1], [0], [0], [1], [0, 0, 1, 1], [], []>} : vector<16x32xf32>, vector<32x32xf32>, vector<16x32xf32> -> vector<16x32xf32>
    %96 = vector.shape_cast %95 : vector<16x32xf32> to vector<2x8x32xf32>
    %c0_20 = arith.constant 0 : index
    %c0_21 = arith.constant 0 : index
    %c0_22 = arith.constant 0 : index
    %97 = vector.load %arg7[%c0_20, %c0_21, %c0_22] : memref<2x8x32xf32, #tpu.memory_space<vmem>>, vector<2x8x32xf32>
    tpu.vector_store %arg7[%c0_20, %c0_21, %c0_22], %96 {strides = array<i32>} : memref<2x8x32xf32, #tpu.memory_space<vmem>>, vector<2x8x32xf32>,
    return
  }
  func.func @transform_0(%arg0: i32) -> (i32, i32, i32) {
    %c0_i32 = arith.constant 0 : i32
    %c0_i32_0 = arith.constant 0 : i32
    %c0_i32_1 = arith.constant 0 : i32
    %c0_i32_2 = arith.constant 0 : i32
    return %c0_i32, %c0_i32_0, %c0_i32_1 : i32, i32, i32
  }
  func.func @transform_1(%arg0: i32) -> (i32, i32, i32) {
    %c0_i32 = arith.constant 0 : i32
    %c0_i32_0 = arith.constant 0 : i32
    %c0_i32_1 = arith.constant 0 : i32
    %c0_i32_2 = arith.constant 0 : i32
    return %c0_i32, %c0_i32_0, %c0_i32_1 : i32, i32, i32
  }
  func.func @transform_2(%arg0: i32) -> (i32, i32, i32) {
    %c0_i32 = arith.constant 0 : i32
    %c0_i32_0 = arith.constant 0 : i32
    %c0_i32_1 = arith.constant 0 : i32
    %c0_i32_2 = arith.constant 0 : i32
    return %c0_i32, %c0_i32_0, %c0_i32_1 : i32, i32, i32
  }
  func.func @transform_3(%arg0: i32) -> (i32, i32, i32) {
    %c0_i32 = arith.constant 0 : i32
    %c0_i32_0 = arith.constant 0 : i32
    %c0_i32_1 = arith.constant 0 : i32
    %c0_i32_2 = arith.constant 0 : i32
    return %c0_i32, %c0_i32_0, %c0_i32_1 : i32, i32, i32
  }
  func.func @transform_4(%arg0: i32) -> (i32, i32) {
    %c0_i32 = arith.constant 0 : i32
    %c0_i32_0 = arith.constant 0 : i32
    %c0_i32_1 = arith.constant 0 : i32
    return %c0_i32, %c0_i32_0 : i32, i32
  }
  func.func @transform_5(%arg0: i32) -> (i32, i32) {
    %c0_i32 = arith.constant 0 : i32
    %c0_i32_0 = arith.constant 0 : i32
    %c0_i32_1 = arith.constant 0 : i32
    return %c0_i32, %c0_i32_0 : i32, i32
  }
  func.func @transform_6(%arg0: i32) -> (i32, i32, i32) {
    %c0_i32 = arith.constant 0 : i32
    %c0_i32_0 = arith.constant 0 : i32
    %c0_i32_1 = arith.constant 0 : i32
    %c0_i32_2 = arith.constant 0 : i32
    return %c0_i32, %c0_i32_0, %c0_i32_1 : i32, i32, i32
  }
}

</mosaic_0001>

<bundles_post_ra>
// kernel: multi_head_attention_pallas.1
= control target key start
LH: loop header
LB: loop body
LE: loop exit
PB: predicated region body
PF: predicated region fallthrough
CT: control target
= control target key end

     0   :  { %s1901_s27 = smov 32   ;;  %s1902_s28 = smov 64   ;;  %s2212_s0 = inlined_call_operand.vmem [shape: f32[2,8,32], index: 0, kind: input, shape index: {}]   ;;  %s2213_s1 = inlined_call_operand.vmem [shape: f32[2,8,32], index: 1, kind: input, shape index: {}]   ;;  %s2214_s2 = inlined_call_operand.vmem [shape: f32[2,8,32], index: 2, kind: input, shape index: {}]   ;;  %s2215_s3 = inlined_call_operand.vmem [shape: f32[2,8,8], index: 3, kind: input, shape index: {}]   ;;  %s2216_s4 = inlined_call_operand.vmem [shape: f32[96,96], index: 4, kind: input, shape index: {}]   ;;  %s2217_s5 = inlined_call_operand.vmem [shape: f32[32,32], index: 5, kind: input, shape index: {}]   ;;  %s2218_s6 = inlined_call_operand.hbm [shape: f32[2,8,32], index: 6, kind: output, shape index: {}]  }
   0x1   :  { %v26_v0 = vld [vmem:[%s2213_s1] sm:$0xff]  ;;  %v27_v2 = vld [vmem:[%s2213_s1 + $0x8] sm:$0xff]  ;;  %v54_v6 = vld [vmem:[%s2216_s4 + $0x10] sm:$0xff] }
   0x2   :  { %v28_v1 = vld [vmem:[%s2214_s2] sm:$0xff]  ;;  %32 = vrot.lane.b32.xlu0 %v26_v0, %s1901_s27  ;;  %v29_v3 = vld [vmem:[%s2214_s2 + $0x8] sm:$0xff]  ;;  %v55_v7 = vld [vmem:[%s2216_s4 + $0x18] sm:$0xff] }
   0x3   :  { %40 = vrot.lane.b32.xlu1 %v28_v1, %s1902_s28  ;;  %v52_v4 = vld [vmem:[%s2216_s4] sm:$0xff]  ;;  %v53_v5 = vld [vmem:[%s2216_s4 + $0x8] sm:$0xff]  ;;  %v1804_v9 = vpack.c.bf16 %v55_v7, %v54_v6 }
   0x4   :  { %v1800_v8 = vpack.c.bf16 %v53_v5, %v52_v4  ;;  %v56_v10 = vld [vmem:[%s2216_s4 + $0x20] sm:$0xff]  ;;  %v57_v11 = vld [vmem:[%s2216_s4 + $0x28] sm:$0xff] }
   0x6   :  { %34 = vrot.lane.b32.xlu0 %v27_v2, %s1901_s27  ;;  %1801 = vmatprep.subr.bf16.mxu0 %v1800_v8 }
   0x7   :  { %42 = vrot.lane.b32.xlu1 %v29_v3, %s1902_s28 }
   0x8   :  { %11 = vsyncpa [#allocation3], 0  ;;  %1803 = vmatpush3.bf16.msra.mxu0 %v1800_v8  ;;  %v1808_v12 = vpack.c.bf16 %v57_v11, %v56_v10  ;;  %v58_v13 = vld [vmem:[%s2216_s4 + $0x30] sm:$0xff]  ;;  %v59_v14 = vld [vmem:[%s2216_s4 + $0x38] sm:$0xff]  ;;  %vm46_vm0 = vcmask 261120   ;;  %vm49_vm1 = vcmask 523264  }
   0x9   :  { %1805 = vmatprep.subr.bf16.mxu0 %v1804_v9  ;;  %v1812_v15 = vpack.c.bf16 %v59_v14, %v58_v13  ;;  %v60_v16 = vld [vmem:[%s2216_s4 + $0x40] sm:$0xff]  ;;  %v61_v17 = vld [vmem:[%s2216_s4 + $0x48] sm:$0xff]  ;;  %v62_v19 = vld [vmem:[%s2216_s4 + $0x50] sm:$0xff]  ;;  %vm64_vm2 = vcmask 785408   ;;  %v1903_v33 = vmov 0.0   ;;  %s1904_s9 = smov 120  }
   0xa   :  { %v1816_v18 = vpack.c.bf16 %v61_v17, %v60_v16  ;;  %v63_v20 = vld [vmem:[%s2216_s4 + $0x58] sm:$0xff]  ;;  %v24_v22 = vld [vmem:[%s2212_s0] sm:$0xff]  ;;  %v25_v27 = vld [vmem:[%s2212_s0 + $0x8] sm:$0xff]  ;;  %1709 = vmatprep.subr.mxu1 %v1903_v33  ;;  %vm1905_vm3 = vmmov 0   ;;  %s1906_s0 = smov 112   ;;  %s1907_s10 = smov 104  }
   0xb   :  { %v1820_v21 = vpack.c.bf16 %v63_v20, %v62_v19  ;;  %1711 = vmatprep.mubr.msk.f32.mxu1 %vm1905_vm3, %v1903_v33  ;;  %s1908_s11 = smov 96   ;;  %vm164_vm4 = vcmask 64512   ;;  %v160_v49 = vld [vmem:[%s2215_s3] sm:$0xff]  ;;  %v161_v53 = vld [vmem:[%s2215_s3 + $0x8] sm:$0xff]  ;;  %s1909_s16 = smov 8   ;;  %vm1480_vm5 = vcmask 130048  }
   0xc   :  { %1807 = vmatpush3.bf16.msra.mxu0 %v1804_v9  ;;  %s1910_s21 = smov 16   ;;  %s1911_s22 = smov 24   ;;  %vm1482_vm6 = vcmask 195584  }
   0xd   :  { %1809 = vmatprep.subr.bf16.mxu0 %v1808_v12 }
  0x10   :  { %1811 = vmatpush3.bf16.msra.mxu0 %v1808_v12 }
  0x11   :  { %1813 = vmatprep.subr.bf16.mxu0 %v1812_v15 }
  0x14   :  { %1815 = vmatpush3.bf16.msra.mxu0 %v1812_v15 }
  0x15   :  { %1817 = vmatprep.subr.bf16.mxu0 %v1816_v18 }
  0x18   :  { %1819 = vmatpush3.bf16.msra.mxu0 %v1816_v18 }
  0x19   :  { %1821 = vmatprep.subr.bf16.mxu0 %v1820_v21 }
  0x1c   :  { %1823 = vmatpush3.bf16.msra.mxu0 %v1820_v21 }
  0x1d   :  { %1749 = vmatprep.subr.mxu0 %v1903_v33 }
  0x74   :  { %v33_v23 = vpop.permute.xlu0 %32 }
  0x75   :  { %v41_v24 = vpop.permute.xlu1 %40  ;;  %v47_v25 = vsel %vm46_vm0, %v24_v22, %v33_v23 }
  0x76   :  { %v50_v26 = vsel %vm49_vm1, %v47_v25, %v41_v24 }
  0x77   :  { %1706 = vmatprep.mubr.msk.f32.mxu0 %vm64_vm2, %v50_v26 }
  0x78   :  { %v35_v28 = vpop.permute.xlu0 %34 }
  0x79   :  { %v43_v29 = vpop.permute.xlu1 %42  ;;  %v48_v30 = vsel %vm46_vm0, %v25_v27, %v35_v28 }
  0x7a   :  { %v51_v31 = vsel %vm49_vm1, %v48_v30, %v43_v29 }
  0x7b   :  { %1707 = vmatmul.mubr.msk.f32.vlgmr.msra.gmra.mrb[0].mxu0 %vm64_vm2, %v51_v31 }
  0x7c   :  { %1751 = vmatprep.mubr.msk.f32.mxu0 %vm1905_vm3, %v1903_v33 }
 0x14e   :  { %v2007_v32 = vpop.f32.mrb[0].mxu0 }
 0x14f   :  { %150 = vrot.lane.b32.xlu1 %v2007_v32, %s1904_s9  ;;  %v2012_v34 = vpop.f32.mrb[1].mxu0 }
 0x150   :  { %147 = vrot.lane.b32.xlu0 %v2012_v34, %s1904_s9 }
 0x153   :  { %154 = vrot.lane.b32.xlu1 %v2007_v32, %s1906_s0 }
 0x154   :  { %152 = vrot.lane.b32.xlu0 %v2012_v34, %s1906_s0 }
 0x157   :  { %158 = vrot.lane.b32.xlu1 %v2007_v32, %s1907_s10 }
 0x158   :  { %156 = vrot.lane.b32.xlu0 %v2012_v34, %s1907_s10 }
 0x15b   :  { %239 = vrot.lane.b32.xlu1 %v2007_v32, %s1908_s11 }
 0x15c   :  { %162 = vrot.lane.b32.xlu0 %v2012_v34, %s1908_s11 }
 0x1c1   :  { %v2025_v35 = vpop.permute.xlu1 %150 }
 0x1c2   :  { %391 = vrot.lane.b32.xlu1 %v2025_v35, %s1908_s11  ;;  %v2028_v36 = vpop.permute.xlu0 %147 }
 0x1c3   :  { %315 = vrot.lane.b32.xlu0 %v2028_v36, %s1908_s11 }
 0x1c5   :  { %v2031_v37 = vpop.permute.xlu1 %154 }
 0x1c6   :  { %543 = vrot.lane.b32.xlu1 %v2031_v37, %s1908_s11  ;;  %v2034_v38 = vpop.permute.xlu0 %152 }
 0x1c7   :  { %467 = vrot.lane.b32.xlu0 %v2034_v38, %s1908_s11 }
 0x1c9   :  { %v2037_v39 = vpop.permute.xlu1 %158 }
 0x1ca   :  { %695 = vrot.lane.b32.xlu1 %v2037_v39, %s1908_s11  ;;  %v2040_v40 = vpop.permute.xlu0 %156 }
 0x1cb   :  { %619 = vrot.lane.b32.xlu0 %v2040_v40, %s1908_s11 }
 0x1cd   :  { %v240_v42 = vpop.permute.xlu1 %239 }
 0x1ce   :  { %v163_v41 = vpop.permute.xlu0 %162 }
 0x1cf   :  { %1710 = vmatpush3.xpose.msk.msra.mxu1 %vm164_vm4, %v163_v41 }
 0x1d0   :  { %1714 = vmatprep.subr.mxu1 %v1903_v33 }
 0x1d2   :  { %1712 = vmatmul.mubr.msk.f32.vlgmr.msra.gmra.mrb[0].mxu1 %vm164_vm4, %v2012_v34 }
 0x1d3   :  { %1715 = vmatpush3.xpose.msk.msra.mxu1 %vm164_vm4, %v240_v42  ;;  %1716 = vmatprep.mubr.msk.f32.mxu1 %vm1905_vm3, %v1903_v33 }
 0x1d4   :  { %1719 = vmatprep.subr.mxu1 %v1903_v33 }
 0x1d6   :  { %1717 = vmatmul.mubr.msk.f32.vlgmr.msra.gmra.mrb[2].mxu1 %vm164_vm4, %v2007_v32 }
 0x1d7   :  { %1721 = vmatprep.mubr.msk.f32.mxu1 %vm1905_vm3, %v1903_v33 }
 0x234   :  { %v392_v44 = vpop.permute.xlu1 %391 }
 0x235   :  { %v316_v43 = vpop.permute.xlu0 %315 }
 0x236   :  { %1720 = vmatpush3.xpose.msk.msra.mxu1 %vm164_vm4, %v316_v43 }
 0x237   :  { %1724 = vmatprep.subr.mxu1 %v1903_v33 }
 0x238   :  { %v544_v46 = vpop.permute.xlu1 %543 }
 0x239   :  { %1722 = vmatmul.mubr.msk.f32.vlgmr.msra.gmra.mrb[4].mxu1 %vm164_vm4, %v2028_v36  ;;  %v468_v45 = vpop.permute.xlu0 %467 }
 0x23a   :  { %1725 = vmatpush3.xpose.msk.msra.mxu1 %vm164_vm4, %v392_v44  ;;  %1726 = vmatprep.mubr.msk.f32.mxu1 %vm1905_vm3, %v1903_v33 }
 0x23b   :  { %1729 = vmatprep.subr.mxu1 %v1903_v33 }
 0x23c   :  { %v696_v48 = vpop.permute.xlu1 %695 }
 0x23d   :  { %1727 = vmatmul.mubr.msk.f32.vlgmr.msra.gmra.mrb[6].mxu1 %vm164_vm4, %v2025_v35  ;;  %v620_v47 = vpop.permute.xlu0 %619 }
 0x23e   :  { %1730 = vmatpush3.xpose.msk.msra.mxu1 %vm164_vm4, %v468_v45  ;;  %1731 = vmatprep.mubr.msk.f32.mxu1 %vm1905_vm3, %v1903_v33 }
 0x23f   :  { %1734 = vmatprep.subr.mxu1 %v1903_v33 }
 0x241   :  { %1732 = vmatmul.mubr.msk.f32.vlgmr.msra.gmra.mrb[8].mxu1 %vm164_vm4, %v2034_v38 }
 0x242   :  { %1735 = vmatpush3.xpose.msk.msra.mxu1 %vm164_vm4, %v544_v46  ;;  %1736 = vmatprep.mubr.msk.f32.mxu1 %vm1905_vm3, %v1903_v33 }
 0x243   :  { %1739 = vmatprep.subr.mxu1 %v1903_v33 }
 0x245   :  { %1737 = vmatmul.mubr.msk.f32.vlgmr.msra.gmra.mrb[10].mxu1 %vm164_vm4, %v2031_v37 }
 0x246   :  { %1740 = vmatpush3.xpose.msk.msra.mxu1 %vm164_vm4, %v620_v47  ;;  %1741 = vmatprep.mubr.msk.f32.mxu1 %vm1905_vm3, %v1903_v33 }
 0x247   :  { %1744 = vmatprep.subr.mxu1 %v1903_v33 }
 0x249   :  { %1742 = vmatmul.mubr.msk.f32.vlgmr.msra.gmra.mrb[12].mxu1 %vm164_vm4, %v2040_v40 }
 0x24a   :  { %1745 = vmatpush3.xpose.msk.msra.mxu1 %vm164_vm4, %v696_v48  ;;  %1746 = vmatprep.mubr.msk.f32.mxu1 %vm1905_vm3, %v1903_v33 }
 0x24b   :  { %1754 = vmatprep.subr.mxu1 %v1903_v33 }
 0x24d   :  { %1747 = vmatmul.mubr.msk.f32.vlgmr.msra.gmra.mrb[14].mxu1 %vm164_vm4, %v2037_v39 }
 0x24e   :  { %1756 = vmatprep.mubr.msk.f32.mxu1 %vm1905_vm3, %v1903_v33 }
 0x2a5   :  { %v235_v50 = vpop.f32.mrb[0].mxu1 }
 0x2a6   :  { %v236_v51 = vadd.f32 %v235_v50, %v160_v49  ;;  %v1713_v52 = vpop.f32.mrb[1].mxu1 }
 0x2a8   :  { %v771_v54 = vsel %vm164_vm4, %v236_v51, -inf }
 0x2a9   :  { %772 = vmax.xlane.f32.xlu0 %v771_v54  ;;  %v311_v55 = vpop.f32.mrb[2].mxu1 }
 0x2aa   :  { %v312_v56 = vadd.f32 %v311_v55, %v161_v53  ;;  %v1718_v57 = vpop.f32.mrb[3].mxu1 }
 0x2ac   :  { %v774_v58 = vsel %vm164_vm4, %v312_v56, -inf }
 0x2ad   :  { %775 = vmax.xlane.f32.xlu1 %v774_v58 }
 0x30c   :  { %v387_v59 = vpop.f32.mrb[4].mxu1 }
 0x30d   :  { %v388_v60 = vadd.f32 %v387_v59, %v160_v49  ;;  %v1723_v61 = vpop.f32.mrb[5].mxu1 }
 0x30f   :  { %v777_v62 = vsel %vm164_vm4, %v388_v60, -inf }
 0x310   :  { %778 = vmax.xlane.f32.xlu0 %v777_v62  ;;  %v463_v63 = vpop.f32.mrb[6].mxu1 }
 0x311   :  { %v464_v0 = vadd.f32 %v463_v63, %v161_v53  ;;  %v1728_v1 = vpop.f32.mrb[7].mxu1 }
 0x313   :  { %v780_v2 = vsel %vm164_vm4, %v464_v0, -inf }
 0x314   :  { %781 = vmax.xlane.f32.xlu0 %v780_v2  ;;  %v539_v3 = vpop.f32.mrb[8].mxu1 }
 0x315   :  { %v540_v4 = vadd.f32 %v539_v3, %v160_v49  ;;  %v1733_v5 = vpop.f32.mrb[9].mxu1 }
 0x317   :  { %v783_v6 = vsel %vm164_vm4, %v540_v4, -inf }
 0x318   :  { %784 = vmax.xlane.f32.xlu1 %v783_v6  ;;  %v615_v7 = vpop.f32.mrb[10].mxu1 }
 0x319   :  { %v616_v8 = vadd.f32 %v615_v7, %v161_v53  ;;  %v1738_v9 = vpop.f32.mrb[11].mxu1 }
 0x31b   :  { %v786_v10 = vsel %vm164_vm4, %v616_v8, -inf }
 0x31c   :  { %787 = vmax.xlane.f32.xlu0 %v786_v10  ;;  %v691_v11 = vpop.f32.mrb[12].mxu1 }
 0x31d   :  { %v692_v12 = vadd.f32 %v691_v11, %v160_v49  ;;  %v1743_v13 = vpop.f32.mrb[13].mxu1 }
 0x31f   :  { %v789_v14 = vsel %vm164_vm4, %v692_v12, -inf }
 0x320   :  { %790 = vmax.xlane.f32.xlu1 %v789_v14  ;;  %v767_v15 = vpop.f32.mrb[14].mxu1 }
 0x321   :  { %v768_v16 = vadd.f32 %v767_v15, %v161_v53  ;;  %v1748_v17 = vpop.f32.mrb[15].mxu1 }
 0x323   :  { %v792_v18 = vsel %vm164_vm4, %v768_v16, -inf }
 0x324   :  { %793 = vmax.xlane.f32.xlu0 %v792_v18 }
 0x331   :  { %859 = vrot.lane.b32.xlu1 %v2012_v34, %s1902_s28 }
 0x335   :  { %1011 = vrot.lane.b32.xlu1 %v2028_v36, %s1902_s28 }
 0x336   :  { %v773_v21 = vpop.xlane.xlu0 %772 }
 0x337   :  { %v795_v22 = vsub.f32 %v236_v51, %v773_v21 }
 0x339   :  { %1087 = vrot.lane.b32.xlu1 %v2025_v35, %s1902_s28  ;;  %v803_v24 = vmul.f32 1.442695, %v795_v22 }
 0x33a   :  { %935 = vrot.lane.b32.xlu0 %v2007_v32, %s1902_s28  ;;  %v776_v19 = vpop.xlane.xlu1 %775 }
 0x33b   :  { %v796_v20 = vsub.f32 %v312_v56, %v776_v19 }
 0x33d   :  { %1239 = vrot.lane.b32.xlu1 %v2031_v37, %s1902_s28  ;;  %v805_v23 = vmul.f32 1.442695, %v796_v20 }
 0x33e   :  { %1163 = vrot.lane.b32.xlu0 %v2034_v38, %s1902_s28 }
 0x33f   :  { %1845 = vpow2.f32 %v805_v23 }
 0x340   :  { %1847 = vpow2.f32 %v803_v24 }
 0x349   :  { %v2117_v25 = vpop.eup %1845 }
 0x34a   :  { %v822_v26 = vsel %vm164_vm4, %v2117_v25, 0.0  ;;  %v2121_v27 = vpop.eup %1847 }
 0x34b   :  { %v819_v28 = vsel %vm164_vm4, %v2121_v27, 0.0 }
 0x35d   :  { %823 = vadd.xlane.f32.xlu0 %v822_v26 }
 0x361   :  { %820 = vadd.xlane.f32.xlu1 %v819_v28 }
 0x39d   :  { %v779_v29 = vpop.xlane.xlu0 %778 }
 0x39e   :  { %v797_v30 = vsub.f32 %v388_v60, %v779_v29 }
 0x3a0   :  { %v807_v31 = vmul.f32 1.442695, %v797_v30 }
 0x3a1   :  { %v782_v32 = vpop.xlane.xlu0 %781 }
 0x3a2   :  { %1849 = vpow2.f32 %v807_v31  ;;  %v798_v34 = vsub.f32 %v464_v0, %v782_v32  ;;  %v1499_v32 = vld [vmem:[%s2217_s5] sm:$0xff] }
 0x3a4   :  { %v809_v35 = vmul.f32 1.442695, %v798_v34 }
 0x3a5   :  { %v785_v36 = vpop.xlane.xlu1 %784 }
 0x3a6   :  { %1851 = vpow2.f32 %v809_v35  ;;  %v799_v37 = vsub.f32 %v540_v4, %v785_v36 }
 0x3a8   :  { %v811_v38 = vmul.f32 1.442695, %v799_v37  ;;  %v1501_v37 = vld [vmem:[%s2217_s5 + $0x10] sm:$0xff] }
 0x3a9   :  { %v788_v41 = vpop.xlane.xlu0 %787 }
 0x3aa   :  { %1853 = vpow2.f32 %v811_v38  ;;  %v800_v42 = vsub.f32 %v616_v8, %v788_v41  ;;  %v1502_v38 = vld [vmem:[%s2217_s5 + $0x18] sm:$0xff] }
 0x3ac   :  { %v2125_v43 = vpop.eup %1849  ;;  %v813_v44 = vmul.f32 1.442695, %v800_v42  ;;  %v1828_v42 = vpack.c.bf16 %v1502_v38, %v1501_v37 }
 0x3ad   :  { %v791_v45 = vpop.xlane.xlu1 %790  ;;  %v825_v46 = vsel %vm164_vm4, %v2125_v43, 0.0 }
 0x3ae   :  { %1855 = vpow2.f32 %v813_v44  ;;  %v801_v47 = vsub.f32 %v692_v12, %v791_v45  ;;  %826 = vadd.xlane.f32.xlu1 %v825_v46 }
 0x3b0   :  { %v2129_v48 = vpop.eup %1851  ;;  %v815_v49 = vmul.f32 1.442695, %v801_v47 }
 0x3b1   :  { %v860_v50 = vpop.permute.xlu1 %859  ;;  %v794_v51 = vpop.xlane.xlu0 %793  ;;  %v828_v52 = vsel %vm164_vm4, %v2129_v48, 0.0 }
 0x3b2   :  { %1857 = vpow2.f32 %v815_v49  ;;  %v802_v53 = vsub.f32 %v768_v16, %v794_v51  ;;  %1750 = vmatpush3.msra.mxu0 %v860_v50  ;;  %829 = vadd.xlane.f32.xlu0 %v828_v52 }
 0x3b3   :  { %1759 = vmatprep.subr.mxu0 %v1903_v33 }
 0x3b4   :  { %v1854_v54 = vpop.eup %1853  ;;  %v817_v55 = vmul.f32 1.442695, %v802_v53 }
 0x3b5   :  { %v936_v56 = vpop.permute.xlu0 %935  ;;  %v831_v57 = vsel %vm164_vm4, %v1854_v54, 0.0  ;;  %v1012_v0 = vpop.permute.xlu1 %1011 }
 0x3b6   :  { %1859 = vpow2.f32 %v817_v55  ;;  %832 = vadd.xlane.f32.xlu1 %v831_v57  ;;  %1755 = vmatpush3.msra.mxu1 %v936_v56 }
 0x3b7   :  { %1764 = vmatprep.subr.mxu1 %v1903_v33 }
 0x3b8   :  { %v1856_v58 = vpop.eup %1855 }
 0x3b9   :  { %v834_v59 = vsel %vm164_vm4, %v1856_v58, 0.0  ;;  %v1088_v1 = vpop.permute.xlu1 %1087  ;;  %v1164_v2 = vpop.permute.xlu0 %1163 }
 0x3ba   :  { %835 = vadd.xlane.f32.xlu0 %v834_v59 }
 0x3bc   :  { %v2137_v60 = vpop.eup %1857 }
 0x3bd   :  { %v837_v61 = vsel %vm164_vm4, %v2137_v60, 0.0  ;;  %v1240_v3 = vpop.permute.xlu1 %1239 }
 0x3be   :  { %838 = vadd.xlane.f32.xlu1 %v837_v61 }
 0x3c0   :  { %v2141_v62 = vpop.eup %1859 }
 0x3c1   :  { %v840_v63 = vsel %vm164_vm4, %v2141_v62, 0.0 }
 0x3c2   :  { %841 = vadd.xlane.f32.xlu0 %v840_v63 }
 0x3cf   :  { %1391 = vrot.lane.b32.xlu1 %v2037_v39, %s1902_s28 }
 0x3d8   :  { %1315 = vrot.lane.b32.xlu0 %v2040_v40, %s1902_s28 }
 0x3ea   :  { %v824_v4 = vpop.xlane.xlu0 %823 }
 0x3eb   :  { %1861 = vrcp.f32 %v824_v4 }
 0x3ee   :  { %v821_v5 = vpop.xlane.xlu1 %820 }
 0x3ef   :  { %1863 = vrcp.f32 %v821_v5 }
 0x3f5   :  { %v1862_v6 = vpop.eup %1861 }
 0x3f6   :  { %v852_v7 = vmul.f32 %v1862_v6, %v2117_v25 }
 0x3f8   :  { %1757 = vmatmul.mubr.msk.f32.vlgmr.msra.gmra.mrb[16].mxu1 %vm164_vm4, %v852_v7 }
 0x3f9   :  { %v1864_v8 = vpop.eup %1863  ;;  %1765 = vmatpush3.msra.mxu1 %v1088_v1  ;;  %1766 = vmatprep.mubr.msk.f32.mxu1 %vm1905_vm3, %v1903_v33 }
 0x3fa   :  { %v851_v39 = vmul.f32 %v1864_v8, %v2121_v27  ;;  %1774 = vmatprep.subr.mxu1 %v1903_v33 }
 0x3fc   :  { %1752 = vmatmul.mubr.msk.f32.vlgmr.msra.gmra.mrb[2].mxu0 %vm164_vm4, %v851_v39 }
 0x3fd   :  { %1760 = vmatpush3.msra.mxu0 %v1012_v0  ;;  %1761 = vmatprep.mubr.msk.f32.mxu0 %vm1905_vm3, %v1903_v33 }
 0x3fe   :  { %1769 = vmatprep.subr.mxu0 %v1903_v33 }
 0x43b   :  { %v827_v40 = vpop.xlane.xlu1 %826 }
 0x43c   :  { %1865 = vrcp.f32 %v827_v40 }
 0x43f   :  { %v830_v9 = vpop.xlane.xlu0 %829 }
 0x440   :  { %1867 = vrcp.f32 %v830_v9 }
 0x443   :  { %v833_v10 = vpop.xlane.xlu1 %832 }
 0x444   :  { %1869 = vrcp.f32 %v833_v10 }
 0x446   :  { %v1866_v11 = vpop.eup %1865 }
 0x447   :  { %v853_v12 = vmul.f32 %v1866_v11, %v2125_v43  ;;  %v836_v13 = vpop.xlane.xlu0 %835 }
 0x448   :  { %1871 = vrcp.f32 %v836_v13 }
 0x449   :  { %1762 = vmatmul.mubr.msk.f32.vlgmr.msra.gmra.mrb[4].mxu0 %vm164_vm4, %v853_v12 }
 0x44a   :  { %v1868_v14 = vpop.eup %1867  ;;  %1770 = vmatpush3.msra.mxu0 %v1164_v2  ;;  %1771 = vmatprep.mubr.msk.f32.mxu0 %vm1905_vm3, %v1903_v33 }
 0x44b   :  { %v854_v15 = vmul.f32 %v1868_v14, %v2129_v48  ;;  %v839_v16 = vpop.xlane.xlu1 %838  ;;  %1779 = vmatprep.subr.mxu0 %v1903_v33 }
 0x44c   :  { %1873 = vrcp.f32 %v839_v16 }
 0x44d   :  { %1767 = vmatmul.mubr.msk.f32.vlgmr.msra.gmra.mrb[18].mxu1 %vm164_vm4, %v854_v15 }
 0x44e   :  { %v1870_v17 = vpop.eup %1869  ;;  %1775 = vmatpush3.msra.mxu1 %v1240_v3  ;;  %1776 = vmatprep.mubr.msk.f32.mxu1 %vm1905_vm3, %v1903_v33 }
 0x44f   :  { %v855_v18 = vmul.f32 %v1870_v17, %v1854_v54  ;;  %v842_v19 = vpop.xlane.xlu0 %841  ;;  %1784 = vmatprep.subr.mxu1 %v1903_v33  ;;  %v1392_v23 = vpop.permute.xlu1 %1391 }
 0x450   :  { %1875 = vrcp.f32 %v842_v19 }
 0x451   :  { %1772 = vmatmul.mubr.msk.f32.vlgmr.msra.gmra.mrb[6].mxu0 %vm164_vm4, %v855_v18 }
 0x452   :  { %v1872_v20 = vpop.eup %1871  ;;  %1781 = vmatprep.mubr.msk.f32.mxu0 %vm1905_vm3, %v1903_v33 }
 0x453   :  { %v856_v21 = vmul.f32 %v1872_v20, %v1856_v58  ;;  %v1316_v22 = vpop.permute.xlu0 %1315 }
 0x454   :  { %1780 = vmatpush3.msra.mxu0 %v1316_v22 }
 0x455   :  { %1777 = vmatmul.mubr.msk.f32.vlgmr.msra.gmra.mrb[20].mxu1 %vm164_vm4, %v856_v21 }
 0x456   :  { %v1874_v24 = vpop.eup %1873  ;;  %1785 = vmatpush3.msra.mxu1 %v1392_v23  ;;  %1786 = vmatprep.mubr.msk.f32.mxu1 %vm1905_vm3, %v1903_v33  ;;  %v1500_v33 = vld [vmem:[%s2217_s5 + $0x8] sm:$0xff]  ;;  %s1912_s5 = smov [#allocation2]  }
 0x457   :  { %v857_v25 = vmul.f32 %v1874_v24, %v2137_v60  ;;  %v1824_v35 = vpack.c.bf16 %v1500_v33, %v1499_v32  ;;  %s1591_s23 = sshll.u32 %s1912_s5, 4  ;;  %s1592_s23 = int_to_ptr.vmem [resolvable:$true] %s1591_s23 }
 0x458   :  { %s1877_s24 = scalar_lea.vmem %s1592_s23, 256  ;;  %p1882_p1 = scmp.lt.s32.totalorder %s1592_s23, %s1592_s23 }
 0x459   :  { %1782 = vmatmul.mubr.msk.f32.vlgmr.msra.gmra.mrb[8].mxu0 %vm164_vm4, %v857_v25  ;;  %1825 = vmatprep.subr.bf16.mxu0 %v1824_v35  ;;  %p1878_p0 = scmp.ne.s32.totalorder %s1592_s23, %s1877_s24  ;;  %p1883_p2 = scmp.lt.s32.totalorder %s1877_s24, %s1877_s24 }
 0x45a   :  { %v1876_v26 = vpop.eup %1875  ;;  %1827 = vmatpush3.bf16.msra.mxu0 %v1824_v35 }
 0x45b   :  { %v858_v27 = vmul.f32 %v1876_v26, %v2141_v62  ;;  %1829 = vmatprep.subr.bf16.mxu0 %v1828_v42  ;;  %p1884_p3 = por %p1883_p2, %p1882_p1 }
 0x45d   :  { %1787 = vmatmul.mubr.msk.f32.vlgmr.msra.gmra.mrb[22].mxu1 %vm164_vm4, %v858_v27  ;;  %p1885_p4 = pnand %p1884_p3, %p1878_p0 }
 0x45e   :  { %1831 = vmatpush3.bf16.msra.mxu0 %v1828_v42 }
 0x4cb   :  { %v1007_v28 = vpop.f32.mrb[16].mxu1 }
 0x4cc   :  { %v1758_v29 = vpop.f32.mrb[17].mxu1 }
 0x4cf   :  { %v931_v30 = vpop.f32.mrb[2].mxu0 }
 0x4d0   :  { %v1753_v31 = vpop.f32.mrb[3].mxu0 }
 0x51c   :  { %v1083_v34 = vpop.f32.mrb[4].mxu0 }
 0x51d   :  { %v1763_v36 = vpop.f32.mrb[5].mxu0  ;;  %1468 = vrot.lane.b32.xlu0 %v1083_v34, %s1909_s16 }
 0x520   :  { %v1159_v41 = vpop.f32.mrb[18].mxu1 }
 0x521   :  { %1485 = vrot.lane.b32.xlu0 %v1159_v41, %s1909_s16  ;;  %v1768_v43 = vpop.f32.mrb[19].mxu1 }
 0x524   :  { %v1235_v44 = vpop.f32.mrb[6].mxu0 }
 0x525   :  { %1472 = vrot.lane.b32.xlu1 %v1235_v44, %s1910_s21  ;;  %v1773_v45 = vpop.f32.mrb[7].mxu0 }
 0x528   :  { %v1311_v46 = vpop.f32.mrb[20].mxu1 }
 0x529   :  { %1489 = vrot.lane.b32.xlu0 %v1311_v46, %s1910_s21  ;;  %v1778_v47 = vpop.f32.mrb[21].mxu1 }
 0x52c   :  { %v1387_v48 = vpop.f32.mrb[8].mxu0 }
 0x52d   :  { %1476 = vrot.lane.b32.xlu1 %v1387_v48, %s1911_s22  ;;  %v1783_v49 = vpop.f32.mrb[9].mxu0 }
 0x530   :  { %v1463_v50 = vpop.f32.mrb[22].mxu1 }
 0x531   :  { %v1788_v51 = vpop.f32.mrb[23].mxu1  ;;  %1493 = vrot.lane.b32.xlu1 %v1463_v50, %s1911_s22 }
 0x58f   :  { %v1469_v52 = vpop.permute.xlu0 %1468 }
 0x590   :  { %v1479_v55 = vsel %vm164_vm4, %v931_v30, %v1469_v52 }
 0x593   :  { %v1486_v54 = vpop.permute.xlu0 %1485 }
 0x594   :  { %v1496_v60 = vsel %vm164_vm4, %v1007_v28, %v1486_v54 }
 0x597   :  { %v1473_v53 = vpop.permute.xlu1 %1472 }
 0x598   :  { %v1481_v56 = vsel %vm1480_vm5, %v1479_v55, %v1473_v53 }
 0x59b   :  { %v1490_v58 = vpop.permute.xlu0 %1489 }
 0x59c   :  { %v1497_v61 = vsel %vm1480_vm5, %v1496_v60, %v1490_v58 }
 0x59f   :  { %v1477_v57 = vpop.permute.xlu1 %1476 }
 0x5a0   :  { %v1483_v59 = vsel %vm1482_vm6, %v1481_v56, %v1477_v57 }
 0x5a1   :  { %1797 = vmatprep.mubr.msk.f32.mxu0 %vm46_vm0, %v1483_v59 }
 0x5a3   :  { %v1494_v62 = vpop.permute.xlu1 %1493 }
 0x5a4   :  { %v1498_v63 = vsel %vm1482_vm6, %v1497_v61, %v1494_v62 }
 0x5a5   :  { %1798 = vmatmul.mubr.msk.f32.vlgmr.msra.gmra.mrb[10].mxu0 %vm46_vm0, %v1498_v63 }
 0x678   :  { %v1799_v0 = vpop.f32.mrb[10].mxu0 }
 0x679   :  { %1585 = vst.msk [vmem:[#allocation2 + $0x8] sm:$0xff] %vm46_vm0, %v1799_v0  ;;  %v1575_v1 = vpop.f32.mrb[11].mxu0 }
 0x67a   :  { %1584 = vst.msk [vmem:[#allocation2] sm:$0xff] %vm46_vm0, %v1575_v1 }
 0x67b   :  { %1888 = shalt.err (!%p1885_p4)
}
 0x67c   :  { %s1889_s27 = scalar_lea.hbm %s2218_s6, 256 }
 0x67d   :  { %p1890_p5 = scmp.ne.s32.totalorder %s2218_s6, %s1889_s27  ;;  %p1893_p6 = scmp.lt.u32.totalorder %s1889_s27, %s2218_s6 }
 0x67f   :  { %p1895_p7 = pnand %p1893_p6, %p1890_p5 }
 0x681   :  { %1898 = shalt.err (!%p1895_p7)
}
 0x682   :  { %s1913_s4 = smov 128  }
 0x683   :  { %1597 = dma.vmem_to_hbm [thread:$0]  %s1592_s23, 256, %s2218_s6, [#allocation3], %s1913_s4, %s1913_s4, %s1909_s16  }
 0x684   :  { %1899 = dma.done.wait [#allocation3], 256  }
 0x685   :  { %1900 = vsyncadd [#allocation3], 4294967040 }
 0x686   :  { %1601 = vsyncpa [#allocation3], 1 }

</bundles_post_ra>
